<compile_context>
chip_gen: v7x
topology: tpu7x:2x2x1
jax: 0.10.0
libtpu: 0.0.40
codegen_flags: <defaults>
</compile_context>

<pallas_src>
import functools
import math

import jax
import jax.numpy as jnp
from jax import lax
from jax.experimental import pallas as pl
from jax.experimental.pallas import tpu as pltpu

LANE = 128       # lane width (fixed by hardware)
MAX_ROWS = 1024  # max sublane rows per block -> 512 KiB f32 per input per block


def _bce_blur_block_kernel(pred_ref, true_ref, out_ref, *,
                           alpha, block_rows, tail_valid):
    """One grid step: elementwise BCE-with-logits * blur factor, partial-summed
    into an (8, 128) lane-dense output block (no cross-step carried state)."""
    i = pl.program_id(0)

    x = pred_ref[...].astype(jnp.float32)   # logits
    y = true_ref[...].astype(jnp.float32)   # targets

    # Numerically stable BCEWithLogitsLoss(reduction='none'):
    #   max(x, 0) - x*y + log1p(exp(-|x|))
    # Share t = exp(-|x|) between the log1p term and the sigmoid (fewer EUP ops).
    t = jnp.exp(-jnp.abs(x))
    bce = jnp.maximum(x, 0.0) - x * y + jnp.log1p(t)

    # sigmoid(x) derived from the same t (numerically stable split on sign).
    r = 1.0 / (1.0 + t)
    p = jnp.where(x >= 0.0, r, t * r)

    dx = p - y
    alpha_factor = 1.0 - jnp.exp((dx - 1.0) / (alpha + 0.0001))
    loss = bce * alpha_factor

    def partial_sum(l):
        # (block_rows, 128) -> (8, 128): pure elementwise vreg adds (VPU only).
        return l.reshape(block_rows // 8, 8, LANE).sum(axis=0)

    block_elems = block_rows * LANE
    if tail_valid == block_elems:
        # N is block-aligned: no masking anywhere.
        out_ref[0] = partial_sum(loss)
    else:
        last = pl.num_programs(0) - 1

        @pl.when(i != last)
        def _():
            out_ref[0] = partial_sum(loss)

        @pl.when(i == last)
        def _():
            # Only the final block can contain padded / out-of-bounds elements.
            row = lax.broadcasted_iota(jnp.int32, (block_rows, LANE), 0)
            col = lax.broadcasted_iota(jnp.int32, (block_rows, LANE), 1)
            keep = (row * LANE + col) < tail_valid
            out_ref[0] = partial_sum(jnp.where(keep, loss, 0.0))


def bce_blur_with_logits_loss(pred, true, alpha=0.05):
    """Pallas implementation of BCEBlurWithLogitsLoss.forward (returns scalar)."""
    assert pred.shape == true.shape, "pred/true must have identical shapes"
    n = int(math.prod(pred.shape))
    assert n > 0

    # Flatten (no copy for contiguous arrays).  Pad only when N is not a
    # multiple of the 8*128 vreg tile; padded values are masked in-kernel.
    tile = 8 * LANE
    n_pad = ((n + tile - 1) // tile) * tile

    def _prep(a):
        a = jnp.ravel(a)
        if n_pad != n:
            # TODO(synk): only unaligned sizes pay this extra copy.
            a = jnp.pad(a, (0, n_pad - n))
        return a.reshape(n_pad // LANE, LANE)

    pred2d = _prep(pred)
    true2d = _prep(true)

    n_rows = n_pad // LANE                      # multiple of 8
    block_rows = min(MAX_ROWS, n_rows)          # multiple of 8
    grid = pl.cdiv(n_rows, block_rows)
    block_elems = block_rows * LANE
    tail_valid = n - (grid - 1) * block_elems   # valid elements in last block

    partials = pl.pallas_call(
        functools.partial(_bce_blur_block_kernel,
                          alpha=float(alpha),
                          block_rows=block_rows,
                          tail_valid=tail_valid),
        out_shape=jax.ShapeDtypeStruct((grid, 8, LANE), jnp.float32),
        grid=(grid,),
        in_specs=[
            pl.BlockSpec((block_rows, LANE), lambda i: (i, 0)),
            pl.BlockSpec((block_rows, LANE), lambda i: (i, 0)),
        ],
        out_specs=pl.BlockSpec((1, 8, LANE), lambda i: (i, 0, 0)),
        compiler_params=pltpu.CompilerParams(
            dimension_semantics=("parallel",),   # lets v7x split across both TCs
        ),
    )(pred2d, true2d)

    # Final reduce + mean in plain JAX (tiny: grid*8*128 f32).
    return jnp.sum(partials) / jnp.float32(n)


def _reference(pred, true, alpha=0.05):
    """Pure-JAX reference matching the PyTorch module."""
    x = pred.astype(jnp.float32)
    y = true.astype(jnp.float32)
    loss = jnp.maximum(x, 0.0) - x * y + jnp.log1p(jnp.exp(-jnp.abs(x)))
    p = jax.nn.sigmoid(x)
    dx = p - y
    alpha_factor = 1.0 - jnp.exp((dx - 1.0) / (alpha + 0.0001))
    return jnp.mean(loss * alpha_factor)


if __name__ == "__main__":
    key = jax.random.PRNGKey(0)
    k1, k2, k3, k4 = jax.random.split(key, 4)

    # NCHW-like shape: batch=2, channels=4, spatial=16x16 (tile-aligned path).
    shape = (2, 4, 16, 16)
    pred = jax.random.normal(k1, shape, dtype=jnp.float32)            # logits
    true = (jax.random.uniform(k2, shape) > 0.5).astype(jnp.float32)  # targets

    out = bce_blur_with_logits_loss(pred, true, alpha=0.05)
    out = jax.block_until_ready(out)
    ref = _reference(pred, true, alpha=0.05)
    assert jnp.allclose(out, ref, rtol=3e-5, atol=1e-6), (out, ref)

    # Non-tile-aligned shape to exercise the last-block masking path.
    shape2 = (3, 5, 7)
    pred2 = jax.random.normal(k3, shape2, dtype=jnp.float32)
    true2 = (jax.random.uniform(k4, shape2) > 0.5).astype(jnp.float32)
    out2 = jax.block_until_ready(bce_blur_with_logits_loss(pred2, true2, alpha=0.05))
    ref2 = _reference(pred2, true2, alpha=0.05)
    assert jnp.allclose(out2, ref2, rtol=3e-5, atol=1e-6), (out2, ref2)

    print("KERNEL_OK")
</pallas_src>

<mosaic_0001>
module attributes {stable_mosaic.version = 11 : i64} {
  func.func @_bce_blur_block_kernel(%arg0: i32, %arg1: memref<16x128xf32, #tpu.memory_space<vmem>>, %arg2: memref<16x128xf32, #tpu.memory_space<vmem>>, %arg3: memref<1x8x128xf32, #tpu.memory_space<vmem>>) attributes {dimension_semantics = [#tpu.dimension_semantics<parallel>], iteration_bounds = array<i64: 1>, scalar_prefetch = 0 : i64, scratch_operands = 0 : i64, tpu.core_type = #tpu.core_type<tc>, window_params = [{transform_indices = @transform_0, window_bounds = array<i64: 16, 128>}, {transform_indices = @transform_1, window_bounds = array<i64: 16, 128>}, {transform_indices = @transform_2, window_bounds = array<i64: 1, 8, 128>}]} {
    %c0 = arith.constant 0 : index
    %c0_0 = arith.constant 0 : index
    %0 = vector.load %arg1[%c0, %c0_0] : memref<16x128xf32, #tpu.memory_space<vmem>>, vector<16x128xf32>
    %c0_1 = arith.constant 0 : index
    %c0_2 = arith.constant 0 : index
    %1 = vector.load %arg2[%c0_1, %c0_2] : memref<16x128xf32, #tpu.memory_space<vmem>>, vector<16x128xf32>
    %2 = math.absf %0 : vector<16x128xf32>
    %cst = arith.constant 0.000000e+00 : f32
    %3 = vector.broadcast %cst : f32 to vector<16x128xf32>
    %4 = arith.subf %3, %2 : vector<16x128xf32>
    %5 = math.exp %4 : vector<16x128xf32>
    %cst_3 = arith.constant 0.000000e+00 : f32
    %6 = vector.broadcast %cst_3 : f32 to vector<16x128xf32>
    %7 = arith.maximumf %0, %6 : vector<16x128xf32>
    %8 = arith.mulf %0, %1 : vector<16x128xf32>
    %9 = arith.subf %7, %8 : vector<16x128xf32>
    %10 = math.log1p %5 : vector<16x128xf32>
    %11 = arith.addf %9, %10 : vector<16x128xf32>
    %cst_4 = arith.constant 1.000000e+00 : f32
    %12 = vector.broadcast %cst_4 : f32 to vector<16x128xf32>
    %13 = arith.addf %12, %5 : vector<16x128xf32>
    %cst_5 = arith.constant 1.000000e+00 : f32
    %14 = vector.broadcast %cst_5 : f32 to vector<16x128xf32>
    %15 = arith.divf %14, %13 : vector<16x128xf32>
    %cst_6 = arith.constant 0.000000e+00 : f32
    %16 = vector.broadcast %cst_6 : f32 to vector<16x128xf32>
    %17 = arith.cmpf oge, %0, %16 : vector<16x128xf32>
    %18 = arith.mulf %5, %15 : vector<16x128xf32>
    %19 = arith.select %17, %15, %18 : vector<16x128xi1>, vector<16x128xf32>
    %20 = arith.subf %19, %1 : vector<16x128xf32>
    %cst_7 = arith.constant 1.000000e+00 : f32
    %21 = vector.broadcast %cst_7 : f32 to vector<16x128xf32>
    %22 = arith.subf %20, %21 : vector<16x128xf32>
    %cst_8 = arith.constant 5.010000e-02 : f32
    %23 = vector.broadcast %cst_8 : f32 to vector<16x128xf32>
    %24 = arith.divf %22, %23 : vector<16x128xf32>
    %25 = math.exp %24 : vector<16x128xf32>
    %cst_9 = arith.constant 1.000000e+00 : f32
    %26 = vector.broadcast %cst_9 : f32 to vector<16x128xf32>
    %27 = arith.subf %26, %25 : vector<16x128xf32>
    %28 = arith.mulf %11, %27 : vector<16x128xf32>
    %29 = vector.shape_cast %28 : vector<16x128xf32> to vector<2x8x128xf32>
    %cst_10 = arith.constant dense<0.000000e+00> : vector<8x128xf32>
    %30 = vector.multi_reduction <add>, %29, %cst_10 [0] : vector<2x8x128xf32> to vector<8x128xf32>
    %c0_11 = arith.constant 0 : index
    %c0_12 = arith.constant 0 : index
    %c0_13 = arith.constant 0 : index
    %31 = vector.load %arg3[%c0_11, %c0_12, %c0_13] : memref<1x8x128xf32, #tpu.memory_space<vmem>>, vector<1x8x128xf32>
    %32 = vector.shape_cast %31 : vector<1x8x128xf32> to vector<8x128xf32>
    %33 = vector.shape_cast %30 : vector<8x128xf32> to vector<1x8x128xf32>
    tpu.vector_store %arg3[%c0_11, %c0_12, %c0_13], %33 {strides = array<i32>} : memref<1x8x128xf32, #tpu.memory_space<vmem>>, vector<1x8x128xf32>,
    return
  }
  func.func @transform_0(%arg0: i32) -> (i32, i32) {
    %c0_i32 = arith.constant 0 : i32
    %c0_i32_0 = arith.constant 0 : i32
    return %arg0, %c0_i32 : i32, i32
  }
  func.func @transform_1(%arg0: i32) -> (i32, i32) {
    %c0_i32 = arith.constant 0 : i32
    %c0_i32_0 = arith.constant 0 : i32
    return %arg0, %c0_i32 : i32, i32
  }
  func.func @transform_2(%arg0: i32) -> (i32, i32, i32) {
    %c0_i32 = arith.constant 0 : i32
    %c0_i32_0 = arith.constant 0 : i32
    %c0_i32_1 = arith.constant 0 : i32
    return %arg0, %c0_i32, %c0_i32_0 : i32, i32, i32
  }
}

</mosaic_0001>

<bundles_post_ra>
// kernel: tpu_custom_call.1
= control target key start
LH: loop header
LB: loop body
LE: loop exit
PB: predicated region body
PF: predicated region fallthrough
CT: control target
= control target key end

     0   :  { %7 = vsyncpa [#allocation3], 0  ;;  %s274_s0 = inlined_call_operand.hbm [shape: f32[16,128], index: 0, kind: input, shape index: {}]   ;;  %s275_s1 = inlined_call_operand.hbm [shape: f32[16,128], index: 1, kind: input, shape index: {}]   ;;  %s276_s2 = inlined_call_operand.hbm [shape: f32[1,8,128], index: 2, kind: output, shape index: {}]  }
   0x1   :  { %8 = vsyncpa [#allocation6], 0 }
   0x2   :  { %9 = vsyncpa [#allocation4], 0  ;;  %s218_s9 = smov [#allocation2]   ;;  %s146_s13 = scalar_lea.hbm %s274_s0, 256 }
   0x3   :  { %s15_s10 = sshll.u32 %s218_s9, 4  ;;  %p147_p0 = scmp.ne.s32.totalorder %s274_s0, %s146_s13  ;;  %s16_s10 = int_to_ptr.vmem [resolvable:$true] %s15_s10 }
   0x4   :  { %p150_p1 = scmp.lt.u32.totalorder %s146_s13, %s274_s0 }
   0x6   :  { %p152_p2 = pnand %p150_p1, %p147_p0 }
   0x8   :  { %155 = shalt.err (!%p152_p2)
}
   0x9   :  { %s156_s18 = scalar_lea.vmem %s16_s10, 256  ;;  %p161_p4 = scmp.lt.s32.totalorder %s16_s10, %s16_s10 }
   0xa   :  { %p157_p3 = scmp.ne.s32.totalorder %s16_s10, %s156_s18  ;;  %p162_p5 = scmp.lt.s32.totalorder %s156_s18, %s156_s18 }
   0xc   :  { %p163_p6 = por %p162_p5, %p161_p4 }
   0xe   :  { %p164_p7 = pnand %p163_p6, %p157_p3 }
  0x10   :  { %167 = shalt.err (!%p164_p7)
}
  0x11   :  { %s219_s19 = smov 128   ;;  %s220_s20 = smov 8  }
  0x12   :  { %21 = dma.hbm_to_vmem [thread:$0]  %s274_s0, 256, %s16_s10, [#allocation3], %s219_s19, %s219_s19, %s220_s20  }
  0x13   :  { %s221_s23 = smov [#allocation5]   ;;  %s168_s27 = scalar_lea.hbm %s275_s1, 256 }
  0x14   :  { %s27_s24 = sshll.u32 %s221_s23, 4  ;;  %p169_p8 = scmp.ne.s32.totalorder %s275_s1, %s168_s27  ;;  %s28_s24 = int_to_ptr.vmem [resolvable:$true] %s27_s24 }
  0x15   :  { %p172_p9 = scmp.lt.u32.totalorder %s168_s27, %s275_s1 }
  0x17   :  { %p174_p10 = pnand %p172_p9, %p169_p8 }
  0x19   :  { %177 = shalt.err (!%p174_p10)
}
  0x1a   :  { %s178_s4 = scalar_lea.vmem %s28_s24, 256  ;;  %p183_p12 = scmp.lt.s32.totalorder %s28_s24, %s28_s24 }
  0x1b   :  { %p179_p11 = scmp.ne.s32.totalorder %s28_s24, %s178_s4  ;;  %p184_p13 = scmp.lt.s32.totalorder %s178_s4, %s178_s4 }
  0x1d   :  { %p185_p0 = por %p184_p13, %p183_p12 }
  0x1f   :  { %p186_p1 = pnand %p185_p0, %p179_p11 }
  0x21   :  { %189 = shalt.err (!%p186_p1)
}
  0x22   :  { %33 = dma.hbm_to_vmem [thread:$0]  %s275_s1, 256, %s28_s24, [#allocation6], %s219_s19, %s219_s19, %s220_s20  }
  0x23   :  { %212 = dma.done.wait [#allocation3], 256  }
  0x24   :  { %213 = vsyncadd [#allocation3], 4294967040 }
  0x25   :  { %214 = dma.done.wait [#allocation6], 256  }
  0x26   :  { %215 = vsyncadd [#allocation6], 4294967040  ;;  %v40_v0 = vld [vmem:[#allocation2] sm:$0xff]  ;;  %v41_v1 = vld [vmem:[#allocation2 + $0x8] sm:$0xff]  ;;  %s222_s1 = smov [#allocation7]  }
  0x27   :  { %v44_v2 = vand.u32 2147483647, %v40_v0  ;;  %v45_v3 = vand.u32 2147483647, %v41_v1  ;;  %vm84_vm0 = vcmp.ge.f32.partialorder %v40_v0, 0.0  ;;  %v42_v14 = vld [vmem:[#allocation5] sm:$0xff] }
  0x28   :  { %vm85_vm1 = vcmp.ge.f32.partialorder %v41_v1, 0.0  ;;  %v43_v16 = vld [vmem:[#allocation5 + $0x8] sm:$0xff]  ;;  %v52_v36 = vmax.f32 %v40_v0, 0.0  ;;  %v54_v37 = vmul.f32 %v42_v14, %v40_v0  ;;  %v53_v38 = vmax.f32 %v41_v1, 0.0  ;;  %s113_s6 = sshll.u32 %s222_s1, 4  ;;  %s114_s6 = int_to_ptr.vmem [resolvable:$true] %s113_s6 }
  0x29   :  { %v46_v4 = vsub.f32 0.0, %v44_v2  ;;  %v47_v5 = vsub.f32 0.0, %v45_v3  ;;  %v55_v39 = vmul.f32 %v43_v16, %v41_v1  ;;  %s190_s7 = scalar_lea.vmem %s114_s6, 128  ;;  %p195_p3 = scmp.lt.s32.totalorder %s114_s6, %s114_s6 }
  0x2a   :  { %v56_v44 = vsub.f32 %v52_v36, %v54_v37  ;;  %p191_p2 = scmp.ne.s32.totalorder %s114_s6, %s190_s7  ;;  %p196_p4 = scmp.lt.s32.totalorder %s190_s7, %s190_s7 }
  0x2b   :  { %v48_v6 = vmul.f32 1.442695, %v46_v4  ;;  %v50_v7 = vmul.f32 1.442695, %v47_v5  ;;  %v57_v45 = vsub.f32 %v53_v38, %v55_v39 }
  0x2c   :  { %p197_p5 = por %p196_p4, %p195_p3 }
  0x2d   :  { %130 = vpow2.f32 %v48_v6 }
  0x2e   :  { %132 = vpow2.f32 %v50_v7  ;;  %p198_p6 = pnand %p197_p5, %p191_p2 }
  0x37   :  { %v131_v8 = vpop.eup %130 }
  0x38   :  { %v133_v9 = vpop.eup %132  ;;  %v58_v10 = vadd.f32 1.0, %v131_v8  ;;  %v61_v22 = vmul.f32 -0.5, %v131_v8  ;;  %v64_v31 = vand.u32 2147483647, %v131_v8 }
  0x39   :  { %v67_v11 = vadd.f32 1.0, %v133_v9  ;;  %v70_v24 = vmul.f32 -0.5, %v133_v9  ;;  %v73_v35 = vand.u32 2147483647, %v133_v9 }
  0x3a   :  { %134 = vrcp.f32 %v58_v10  ;;  %v62_v28 = vadd.f32 1.0, %v61_v22  ;;  %vm65_vm2 = vcmp.lt.f32.partialorder %v64_v31, 0.0004427343 }
  0x3b   :  { %136 = vrcp.f32 %v67_v11  ;;  %v71_v32 = vadd.f32 1.0, %v70_v24  ;;  %vm74_vm3 = vcmp.lt.f32.partialorder %v73_v35, 0.0004427343 }
  0x3c   :  { %138 = vlog2.f32 %v58_v10  ;;  %v63_v41 = vmul.f32 %v131_v8, %v62_v28 }
  0x3d   :  { %140 = vlog2.f32 %v67_v11  ;;  %v72_v43 = vmul.f32 %v133_v9, %v71_v32 }
  0x44   :  { %v135_v12 = vpop.eup %134 }
  0x45   :  { %v137_v13 = vpop.eup %136  ;;  %v86_v15 = vmul.f32 %v135_v12, %v131_v8 }
  0x46   :  { %v87_v17 = vmul.f32 %v137_v13, %v133_v9  ;;  %v139_v30 = vpop.eup %138 }
  0x47   :  { %v88_v18 = vsel %vm84_vm0, %v135_v12, %v86_v15  ;;  %v141_v34 = vpop.eup %140  ;;  %v60_v40 = vmul.f32 0.6931472, %v139_v30 }
  0x48   :  { %v89_v19 = vsel %vm85_vm1, %v137_v13, %v87_v17  ;;  %v90_v20 = vsub.f32 %v88_v18, %v42_v14  ;;  %v69_v42 = vmul.f32 0.6931472, %v141_v34 }
  0x49   :  { %v91_v21 = vsub.f32 %v89_v19, %v43_v16  ;;  %v66_v46 = vsel %vm65_vm2, %v63_v41, %v60_v40 }
  0x4a   :  { %v123_v23 = vadd.f32 -1.0, %v90_v20  ;;  %v75_v47 = vsel %vm74_vm3, %v72_v43, %v69_v42  ;;  %v76_v48 = vadd.f32 %v66_v46, %v56_v44 }
  0x4b   :  { %v124_v25 = vadd.f32 -1.0, %v91_v21  ;;  %v77_v50 = vadd.f32 %v75_v47, %v57_v45 }
  0x4c   :  { %v95_v26 = vmul.f32 19.960081, %v123_v23 }
  0x4d   :  { %v96_v27 = vmul.f32 19.960081, %v124_v25 }
  0x4e   :  { %v97_v29 = vmul.f32 1.442695, %v95_v26 }
  0x4f   :  { %v99_v33 = vmul.f32 1.442695, %v96_v27 }
  0x50   :  { %142 = vpow2.f32 %v97_v29 }
  0x51   :  { %144 = vpow2.f32 %v99_v33 }
  0x5a   :  { %v143_v49 = vpop.eup %142 }
  0x5b   :  { %v145_v51 = vpop.eup %144  ;;  %v101_v52 = vsub.f32 1.0, %v143_v49 }
  0x5c   :  { %v102_v53 = vsub.f32 1.0, %v145_v51 }
  0x5d   :  { %v103_v54 = vmul.f32 %v101_v52, %v76_v48 }
  0x5e   :  { %v104_v55 = vmul.f32 %v102_v53, %v77_v50 }
  0x60   :  { %v105_v56 = vadd.f32 %v104_v55, %v103_v54 }
  0x62   :  { %106 = vst [vmem:[#allocation7] sm:$0xff] %v105_v56 }
  0x63   :  { %201 = shalt.err (!%p198_p6)
}
  0x64   :  { %s202_s10 = scalar_lea.hbm %s276_s2, 128 }
  0x65   :  { %p203_p7 = scmp.ne.s32.totalorder %s276_s2, %s202_s10  ;;  %p206_p8 = scmp.lt.u32.totalorder %s202_s10, %s276_s2 }
  0x67   :  { %p208_p9 = pnand %p206_p8, %p203_p7 }
  0x69   :  { %211 = shalt.err (!%p208_p9)
}
  0x6a   :  { %116 = dma.vmem_to_hbm [thread:$0]  %s114_s6, 128, %s276_s2, [#allocation4]  }
  0x6b   :  { %216 = dma.done.wait [#allocation4], 128  }
  0x6c   :  { %217 = vsyncadd [#allocation4], 4294967168 }
  0x6d   :  { %120 = vsyncpa [#allocation3], 1 }
  0x6e   :  { %121 = vsyncpa [#allocation6], 1 }
  0x6f   :  { %122 = vsyncpa [#allocation4], 1 }

</bundles_post_ra>
